<compile_context>
chip_gen: v7x
topology: tpu7x:2x2x1
jax: 0.10.0
libtpu: 0.0.40
codegen_flags: <defaults>
</compile_context>

<pallas_src>
import math

import jax
import jax.numpy as jnp
from jax.experimental import pallas as pl
from jax.experimental.pallas import tpu as pltpu

HIDDEN = 32      # hidden_dim
SEQ = 3          # tempo sequence length implied by spa_out.expand(-1, 3, -1)
SPA_IN = 17      # spa_net = MLP(input_dim=17, ...)
TEMPO_IN = 8     # input_dim_tempo
BATCH = 2

PAD_ROWS = 8     # B*SEQ (=6) padded up to one sublane tile
IN_COLS = 32     # spa(17) + tempo(8) lane-concatenated, padded to 32 lanes

# --- parameter-slab row offsets (single bf16 (P_ROWS, 128) array) ---
P_QKV = 0        # rows 0:32,   lanes 0:96  = [wq/sqrt(H) | wk | wv]
P_FRONT = 32     # rows 32:64,  lanes 0:64  = fused front-end [w1 | wt]
P_FEAT = 64      # rows 64:128, lanes 0:32  = [[w2],[I32]]  (fusion-add folded in)
P_BIAS = 128     # row 128: [b1|bt];  row 129: b2;  row 130: [bq/sqrt(H)|bk|bv]
                 # row 131: lanes 0:32 = wof = wo@wf/SEQ,  lane 32 = b_of = bo@wf+bf
P_MASK = 136     # rows 136:144, lanes 0:8 = additive block-diagonal attention mask
P_POOL = 144     # rows 144:152, lanes 0:8 = sum-pool-over-seq matrix (1.0 entries)
P_ROWS = 152


def mtnet_kernel(x_ref, p_ref, out_ref):
    x = x_ref[...].astype(jnp.bfloat16)                        # (8, 32)

    # static, sublane-aligned views into the packed bf16 parameter slab
    w_front = p_ref[P_FRONT:P_FRONT + IN_COLS, 0:2 * HIDDEN]   # (32, 64)
    w_feat = p_ref[P_FEAT:P_FEAT + 2 * HIDDEN, 0:HIDDEN]       # (64, 32)
    w_qkv = p_ref[P_QKV:P_QKV + HIDDEN, 0:3 * HIDDEN]          # (32, 96)

    b_front = p_ref[P_BIAS + 0:P_BIAS + 1, 0:2 * HIDDEN].astype(jnp.float32)
    b_feat = p_ref[P_BIAS + 1:P_BIAS + 2, 0:HIDDEN].astype(jnp.float32)
    b_qkv = p_ref[P_BIAS + 2:P_BIAS + 3, 0:3 * HIDDEN].astype(jnp.float32)
    w_of = p_ref[P_BIAS + 3:P_BIAS + 4, 0:HIDDEN].astype(jnp.float32)          # (1, 32)
    b_of = p_ref[P_BIAS + 3:P_BIAS + 4, HIDDEN:HIDDEN + 1].astype(jnp.float32)  # (1, 1)

    mask = p_ref[P_MASK:P_MASK + PAD_ROWS, 0:PAD_ROWS].astype(jnp.float32)      # (8, 8)
    pool_m = p_ref[P_POOL:P_POOL + PAD_ROWS, 0:PAD_ROWS].astype(jnp.float32)    # (8, 8)

    # --- fused front-end: spa MLP layer-1 (ReLU) + tempo projection (tanh) ---
    # TODO(synk): TempoNet (2-layer LSTM, hidden_size=H//2, is_submodel=True) source
    # was not provided; stand-in is a per-timestep linear projection + tanh that
    # preserves the (B, 3, H) output contract.
    front = jnp.dot(x, w_front, preferred_element_type=jnp.float32) + b_front   # (8, 64)
    lane = jax.lax.broadcasted_iota(jnp.int32, front.shape, 1)
    act = jnp.where(lane < HIDDEN, jnp.maximum(front, 0.0), jnp.tanh(front))    # relu|tanh

    # --- spa layer-2 with the "spa + tempo" fusion add folded via identity block ---
    feat = jnp.dot(act.astype(jnp.bfloat16), w_feat,
                   preferred_element_type=jnp.float32) + b_feat                 # (8, 32)

    # --- SelfAttention(embed_dim=H): fused QKV projection (Q pre-scaled) ---
    qkv = jnp.dot(feat.astype(jnp.bfloat16), w_qkv,
                  preferred_element_type=jnp.float32) + b_qkv                   # (8, 96)
    q = qkv[:, 0:HIDDEN]
    k = qkv[:, HIDDEN:2 * HIDDEN]
    v = qkv[:, 2 * HIDDEN:3 * HIDDEN]

    # block-diagonal attention over the flattened (B*S) row axis; cross-batch
    # (and padding-row) interactions are killed by the additive -1e30 mask.
    # Score/softmax/context math kept in f32 for accuracy.
    scores = jax.lax.dot_general(q, k, (((1,), (1,)), ((), ())),
                                 preferred_element_type=jnp.float32) + mask     # (8, 8)
    scores = scores - jnp.max(scores, axis=-1, keepdims=True)                   # stable
    p = jnp.exp(scores)
    att = p * pl.reciprocal(jnp.sum(p, axis=-1, keepdims=True), approx=True)    # att_drop: identity
    ctx = jnp.dot(att, v, preferred_element_type=jnp.float32)                   # (8, 32)

    # --- sum-pool over seq, then pre-folded (output_proj . fc_final) head ---
    pool = jnp.dot(pool_m, ctx, preferred_element_type=jnp.float32)             # (8, 32)
    res = jnp.sum(pool * w_of, axis=-1, keepdims=True) + b_of                   # (8, 1)
    out_ref[...] = jnp.broadcast_to(res, (PAD_ROWS, 128))                       # lane-dense


def init_params(key):
    ks = jax.random.split(key, 10)

    def lin(k, fan_in, fan_out):
        bound = 1.0 / math.sqrt(fan_in)
        kw, kb = jax.random.split(k)
        w = jax.random.uniform(kw, (fan_in, fan_out), jnp.float32, -bound, bound)
        b = jax.random.uniform(kb, (1, fan_out), jnp.float32, -bound, bound)
        return w, b

    w1, b1 = lin(ks[0], SPA_IN, HIDDEN)       # MLP layer 1
    w2, b2 = lin(ks[1], HIDDEN, HIDDEN)       # MLP layer 2
    wt, bt = lin(ks[2], TEMPO_IN, HIDDEN)     # tempo_net stand-in
    wq, bq = lin(ks[3], HIDDEN, HIDDEN)
    wk, bk = lin(ks[4], HIDDEN, HIDDEN)
    wv, bv = lin(ks[5], HIDDEN, HIDDEN)
    wo, bo = lin(ks[6], HIDDEN, HIDDEN)
    wf, bf = lin(ks[7], HIDDEN, 1)
    return (w1, b1, w2, b2, wt, bt, wq, bq, wk, bk, wv, bv, wo, bo, wf, bf)


def pack_params(params):
    """Pack all weights/biases (with fusions/foldings pre-applied), the attention
    mask and the pool matrix into one dense bf16 slab -> a single small DMA."""
    (w1, b1, w2, b2, wt, bt, wq, bq, wk, bk, wv, bv, wo, bo, wf, bf) = params
    scale = 1.0 / math.sqrt(HIDDEN)
    slab = jnp.zeros((P_ROWS, 128), jnp.float32)

    # fused QKV, with the 1/sqrt(H) score scale folded into the Q projection
    slab = slab.at[P_QKV:P_QKV + HIDDEN, 0:HIDDEN].set(wq * scale)
    slab = slab.at[P_QKV:P_QKV + HIDDEN, HIDDEN:2 * HIDDEN].set(wk)
    slab = slab.at[P_QKV:P_QKV + HIDDEN, 2 * HIDDEN:3 * HIDDEN].set(wv)
    # fused front-end [w1 | wt] (spa input cols 0:17, tempo cols 17:25)
    slab = slab.at[P_FRONT:P_FRONT + SPA_IN, 0:HIDDEN].set(w1)
    slab = slab.at[P_FRONT + SPA_IN:P_FRONT + SPA_IN + TEMPO_IN,
                   HIDDEN:2 * HIDDEN].set(wt)
    # spa layer-2 with identity block so feat = h@w2 + tmp + b2 in one matmul
    slab = slab.at[P_FEAT:P_FEAT + HIDDEN, 0:HIDDEN].set(w2)
    slab = slab.at[P_FEAT + HIDDEN:P_FEAT + 2 * HIDDEN,
                   0:HIDDEN].set(jnp.eye(HIDDEN, dtype=jnp.float32))
    # biases
    slab = slab.at[P_BIAS + 0, 0:HIDDEN].set(b1[0])
    slab = slab.at[P_BIAS + 0, HIDDEN:2 * HIDDEN].set(bt[0])
    slab = slab.at[P_BIAS + 1, 0:HIDDEN].set(b2[0])
    slab = slab.at[P_BIAS + 2, 0:HIDDEN].set(bq[0] * scale)
    slab = slab.at[P_BIAS + 2, HIDDEN:2 * HIDDEN].set(bk[0])
    slab = slab.at[P_BIAS + 2, 2 * HIDDEN:3 * HIDDEN].set(bv[0])
    # folded output head: wof = wo@wf/SEQ (pool matrix holds exact 1.0 entries),
    # b_of = bo@wf + bf
    wof = (wo @ wf)[:, 0] * (1.0 / SEQ)
    b_of = (bo @ wf + bf)[0, 0]
    slab = slab.at[P_BIAS + 3, 0:HIDDEN].set(wof)
    slab = slab.at[P_BIAS + 3, HIDDEN].set(b_of)
    # block-diagonal additive attention mask + sum-pool matrix over the padded
    # flattened (B*SEQ -> 8) row axis.  Each padded row keeps its own diagonal
    # block unmasked, so no row is fully masked (no inf from the reciprocal).
    rows = jnp.arange(PAD_ROWS)
    blk_r = rows[:, None] // SEQ
    blk_c = rows[None, :] // SEQ
    slab = slab.at[P_MASK:P_MASK + PAD_ROWS, 0:PAD_ROWS].set(
        jnp.where(blk_r == blk_c, 0.0, -1e30))
    slab = slab.at[P_POOL:P_POOL + PAD_ROWS, 0:PAD_ROWS].set(
        jnp.where(blk_c == rows[:, None], 1.0, 0.0))
    return slab.astype(jnp.bfloat16)


@jax.jit
def mtnet_forward(x_spa, x_tempo, params_slab):
    B = x_spa.shape[0]
    bs = B * SEQ
    assert bs <= PAD_ROWS, "add a parallel batch grid for larger batch sizes"
    # Flatten (B, S, .) -> (B*S, .), repeat the spa features per timestep, and
    # lane-concatenate spa|tempo into one (8, 32) input.  All prep is under the
    # same jit as the pallas_call so it fuses into the single dispatch.
    # Padded input columns/rows hit zero weight rows, so padding is exact.
    xs = jnp.repeat(x_spa.reshape(B, SPA_IN).astype(jnp.float32), SEQ, axis=0)
    xt = x_tempo.reshape(bs, TEMPO_IN).astype(jnp.float32)
    x_cat = jnp.zeros((PAD_ROWS, IN_COLS), jnp.float32)
    x_cat = x_cat.at[:bs, :SPA_IN].set(xs)
    x_cat = x_cat.at[:bs, SPA_IN:SPA_IN + TEMPO_IN].set(xt)

    vmem = pl.BlockSpec(memory_space=pltpu.MemorySpace.VMEM)
    out = pl.pallas_call(
        mtnet_kernel,
        out_shape=jax.ShapeDtypeStruct((PAD_ROWS, 128), jnp.float32),
        in_specs=[vmem, vmem],
        out_specs=vmem,
    )(x_cat, params_slab)
    return out[:B, 0]                                   # .squeeze(1) -> (B,)


def mtnet_ref(x_spa, x_tempo, params):
    (w1, b1, w2, b2, wt, bt, wq, bq, wk, bk, wv, bv, wo, bo, wf, bf) = params
    B = x_spa.shape[0]
    xs = x_spa.reshape(B, SPA_IN)
    h = jnp.maximum(xs @ w1 + b1, 0.0)
    spa_out = h @ w2 + b2
    tempo_out = jnp.tanh(jnp.einsum('bst,th->bsh', x_tempo, wt) + bt)
    feature = spa_out[:, None, :] + tempo_out
    q = jnp.einsum('bsh,hd->bsd', feature, wq) + bq
    k = jnp.einsum('bsh,hd->bsd', feature, wk) + bk
    v = jnp.einsum('bsh,hd->bsd', feature, wv) + bv
    att = jax.nn.softmax(jnp.einsum('bqd,bkd->bqk', q, k) / math.sqrt(HIDDEN), axis=-1)
    attn_out = jnp.einsum('bsd,dh->bsh', jnp.einsum('bqk,bkd->bqd', att, v), wo) + bo
    x_pool = attn_out.mean(axis=1)
    return (x_pool @ wf + bf)[:, 0]


if __name__ == "__main__":
    key = jax.random.PRNGKey(0)
    kp, kx1, kx2 = jax.random.split(key, 3)
    params = init_params(kp)
    params_slab = jax.block_until_ready(pack_params(params))

    x_spa = jax.random.normal(kx1, (BATCH, 1, SPA_IN), jnp.float32)
    x_tempo = jax.random.normal(kx2, (BATCH, SEQ, TEMPO_IN), jnp.float32)

    pred = jax.block_until_ready(mtnet_forward(x_spa, x_tempo, params_slab))
    ref = jax.block_until_ready(mtnet_ref(x_spa, x_tempo, params))

    assert pred.shape == (BATCH,), pred.shape
    # bf16 MXU operands on the weight matmuls -> tolerance loosened vs pure f32.
    assert jnp.allclose(pred, ref, atol=2e-2, rtol=2e-2), (pred, ref)
    print("KERNEL_OK")
</pallas_src>

<mosaic_0001>
module attributes {stable_mosaic.version = 11 : i64} {
  func.func @mtnet_kernel(%arg0: memref<8x32xf32, #tpu.memory_space<vmem>>, %arg1: memref<152x128xbf16, #tpu.memory_space<vmem>>, %arg2: memref<8x128xf32, #tpu.memory_space<vmem>>) attributes {dimension_semantics = [], scalar_prefetch = 0 : i64, scratch_operands = 0 : i64, tpu.core_type = #tpu.core_type<tc>} {
    %c0 = arith.constant 0 : index
    %c0_0 = arith.constant 0 : index
    %0 = vector.load %arg0[%c0, %c0_0] : memref<8x32xf32, #tpu.memory_space<vmem>>, vector<8x32xf32>
    %1 = arith.truncf %0 : vector<8x32xf32> to vector<8x32xbf16>
    %c32 = arith.constant 32 : index
    %c0_1 = arith.constant 0 : index
    %2 = vector.load %arg1[%c32, %c0_1] : memref<152x128xbf16, #tpu.memory_space<vmem>>, vector<32x64xbf16>
    %c64 = arith.constant 64 : index
    %c0_2 = arith.constant 0 : index
    %3 = vector.load %arg1[%c64, %c0_2] : memref<152x128xbf16, #tpu.memory_space<vmem>>, vector<64x32xbf16>
    %c0_3 = arith.constant 0 : index
    %c0_4 = arith.constant 0 : index
    %4 = vector.load %arg1[%c0_3, %c0_4] : memref<152x128xbf16, #tpu.memory_space<vmem>>, vector<32x96xbf16>
    %c128 = arith.constant 128 : index
    %c0_5 = arith.constant 0 : index
    %5 = vector.load %arg1[%c128, %c0_5] : memref<152x128xbf16, #tpu.memory_space<vmem>>, vector<1x64xbf16>
    %6 = arith.extf %5 : vector<1x64xbf16> to vector<1x64xf32>
    %c129 = arith.constant 129 : index
    %c0_6 = arith.constant 0 : index
    %7 = vector.load %arg1[%c129, %c0_6] : memref<152x128xbf16, #tpu.memory_space<vmem>>, vector<1x32xbf16>
    %8 = arith.extf %7 : vector<1x32xbf16> to vector<1x32xf32>
    %c130 = arith.constant 130 : index
    %c0_7 = arith.constant 0 : index
    %9 = vector.load %arg1[%c130, %c0_7] : memref<152x128xbf16, #tpu.memory_space<vmem>>, vector<1x96xbf16>
    %10 = arith.extf %9 : vector<1x96xbf16> to vector<1x96xf32>
    %c131 = arith.constant 131 : index
    %c0_8 = arith.constant 0 : index
    %11 = vector.load %arg1[%c131, %c0_8] : memref<152x128xbf16, #tpu.memory_space<vmem>>, vector<1x32xbf16>
    %12 = arith.extf %11 : vector<1x32xbf16> to vector<1x32xf32>
    %c131_9 = arith.constant 131 : index
    %c32_10 = arith.constant 32 : index
    %13 = vector.load %arg1[%c131_9, %c32_10] : memref<152x128xbf16, #tpu.memory_space<vmem>>, vector<1x1xbf16>
    %14 = arith.extf %13 : vector<1x1xbf16> to vector<1x1xf32>
    %c136 = arith.constant 136 : index
    %c0_11 = arith.constant 0 : index
    %15 = vector.load %arg1[%c136, %c0_11] : memref<152x128xbf16, #tpu.memory_space<vmem>>, vector<8x8xbf16>
    %16 = arith.extf %15 : vector<8x8xbf16> to vector<8x8xf32>
    %c144 = arith.constant 144 : index
    %c0_12 = arith.constant 0 : index
    %17 = vector.load %arg1[%c144, %c0_12] : memref<152x128xbf16, #tpu.memory_space<vmem>>, vector<8x8xbf16>
    %18 = arith.extf %17 : vector<8x8xbf16> to vector<8x8xf32>
    %cst = arith.constant dense<0.000000e+00> : vector<8x64xf32>
    %19 = tpu.matmul %1, %2, %cst {dimension_numbers = #tpu.dot_dimension_numbers<[1], [0], [0], [1], [0, 0, 1, 1], [], []>} : vector<8x32xbf16>, vector<32x64xbf16>, vector<8x64xf32> -> vector<8x64xf32>
    %20 = vector.broadcast %6 : vector<1x64xf32> to vector<8x64xf32>
    %21 = arith.addf %19, %20 : vector<8x64xf32>
    %22 = tpu.iota {dimensions = array<i32: 1>} : vector<8x64xi32>
    %c32_i32 = arith.constant 32 : i32
    %23 = vector.broadcast %c32_i32 : i32 to vector<8x64xi32>
    %24 = arith.cmpi slt, %22, %23 : vector<8x64xi32>
    %cst_13 = arith.constant 0.000000e+00 : f32
    %25 = vector.broadcast %cst_13 : f32 to vector<8x64xf32>
    %26 = arith.maximumf %21, %25 : vector<8x64xf32>
    %27 = math.tanh %21 : vector<8x64xf32>
    %28 = arith.select %24, %26, %27 : vector<8x64xi1>, vector<8x64xf32>
    %29 = arith.truncf %28 : vector<8x64xf32> to vector<8x64xbf16>
    %cst_14 = arith.constant dense<0.000000e+00> : vector<8x32xf32>
    %30 = tpu.matmul %29, %3, %cst_14 {dimension_numbers = #tpu.dot_dimension_numbers<[1], [0], [0], [1], [0, 0, 1, 1], [], []>} : vector<8x64xbf16>, vector<64x32xbf16>, vector<8x32xf32> -> vector<8x32xf32>
    %31 = vector.broadcast %8 : vector<1x32xf32> to vector<8x32xf32>
    %32 = arith.addf %30, %31 : vector<8x32xf32>
    %33 = arith.truncf %32 : vector<8x32xf32> to vector<8x32xbf16>
    %cst_15 = arith.constant dense<0.000000e+00> : vector<8x96xf32>
    %34 = tpu.matmul %33, %4, %cst_15 {dimension_numbers = #tpu.dot_dimension_numbers<[1], [0], [0], [1], [0, 0, 1, 1], [], []>} : vector<8x32xbf16>, vector<32x96xbf16>, vector<8x96xf32> -> vector<8x96xf32>
    %35 = vector.broadcast %10 : vector<1x96xf32> to vector<8x96xf32>
    %36 = arith.addf %34, %35 : vector<8x96xf32>
    %37 = vector.extract_strided_slice %36 {offsets = [0, 0], sizes = [8, 32], strides = [1, 1]} : vector<8x96xf32> to vector<8x32xf32>
    %38 = vector.extract_strided_slice %36 {offsets = [0, 32], sizes = [8, 32], strides = [1, 1]} : vector<8x96xf32> to vector<8x32xf32>
    %39 = vector.extract_strided_slice %36 {offsets = [0, 64], sizes = [8, 32], strides = [1, 1]} : vector<8x96xf32> to vector<8x32xf32>
    %cst_16 = arith.constant dense<0.000000e+00> : vector<8x8xf32>
    %40 = tpu.matmul %37, %38, %cst_16 {dimension_numbers = #tpu.dot_dimension_numbers<[1], [1], [0], [0], [0, 0, 1, 0], [], []>} : vector<8x32xf32>, vector<8x32xf32>, vector<8x8xf32> -> vector<8x8xf32>
    %41 = arith.addf %40, %16 : vector<8x8xf32>
    %cst_17 = arith.constant dense<0xFF800000> : vector<8xf32>
    %42 = vector.multi_reduction <maximumf>, %41, %cst_17 [1] : vector<8x8xf32> to vector<8xf32>
    %43 = vector.shape_cast %42 : vector<8xf32> to vector<8x1xf32>
    %44 = vector.broadcast %43 : vector<8x1xf32> to vector<8x8xf32>
    %45 = arith.subf %41, %44 : vector<8x8xf32>
    %46 = math.exp %45 : vector<8x8xf32>
    %cst_18 = arith.constant dense<0.000000e+00> : vector<8xf32>
    %47 = vector.multi_reduction <add>, %46, %cst_18 [1] : vector<8x8xf32> to vector<8xf32>
    %48 = vector.shape_cast %47 : vector<8xf32> to vector<8x1xf32>
    %49 = tpu.reciprocal %48 {approx = true} : vector<8x1xf32> -> vector<8x1xf32>
    %50 = vector.broadcast %49 : vector<8x1xf32> to vector<8x8xf32>
    %51 = arith.mulf %46, %50 : vector<8x8xf32>
    %cst_19 = arith.constant dense<0.000000e+00> : vector<8x32xf32>
    %52 = tpu.matmul %51, %39, %cst_19 {dimension_numbers = #tpu.dot_dimension_numbers<[1], [0], [0], [1], [0, 0, 1, 1], [], []>} : vector<8x8xf32>, vector<8x32xf32>, vector<8x32xf32> -> vector<8x32xf32>
    %cst_20 = arith.constant dense<0.000000e+00> : vector<8x32xf32>
    %53 = tpu.matmul %18, %52, %cst_20 {dimension_numbers = #tpu.dot_dimension_numbers<[1], [0], [0], [1], [0, 0, 1, 1], [], []>} : vector<8x8xf32>, vector<8x32xf32>, vector<8x32xf32> -> vector<8x32xf32>
    %54 = vector.broadcast %12 : vector<1x32xf32> to vector<8x32xf32>
    %55 = arith.mulf %53, %54 : vector<8x32xf32>
    %cst_21 = arith.constant dense<0.000000e+00> : vector<8xf32>
    %56 = vector.multi_reduction <add>, %55, %cst_21 [1] : vector<8x32xf32> to vector<8xf32>
    %57 = vector.shape_cast %56 : vector<8xf32> to vector<8x1xf32>
    %58 = vector.broadcast %14 : vector<1x1xf32> to vector<8x1xf32>
    %59 = arith.addf %57, %58 : vector<8x1xf32>
    %60 = vector.shape_cast %59 : vector<8x1xf32> to vector<8x1xf32>
    %61 = vector.broadcast %60 : vector<8x1xf32> to vector<8x128xf32>
    %c0_22 = arith.constant 0 : index
    %c0_23 = arith.constant 0 : index
    %62 = vector.load %arg2[%c0_22, %c0_23] : memref<8x128xf32, #tpu.memory_space<vmem>>, vector<8x128xf32>
    tpu.vector_store %arg2[%c0_22, %c0_23], %61 {strides = array<i32>} : memref<8x128xf32, #tpu.memory_space<vmem>>, vector<8x128xf32>,
    return
  }
}

</mosaic_0001>

<bundles_post_ra>
// kernel: mtnet_forward.1
= control target key start
LH: loop header
LB: loop body
LE: loop exit
PB: predicated region body
PF: predicated region fallthrough
CT: control target
= control target key end

     0   :  { %v589_v0 = vmov 0.0   ;;  %vm590_vm0 = vmmov 0   ;;  %vm54_vm1 = vcmask 261120   ;;  %v38_v10 = vlaneseq  ;;  %s591_s30 = smov 96   ;;  %s592_s5 = smov 64   ;;  %s686_s1 = inlined_call_operand.vmem [shape: bf16[152,128], index: 1, kind: input, shape index: {}]   ;;  %s687_s0 = inlined_call_operand.vmem [shape: f32[8,32], index: 0, kind: input, shape index: {}]   ;;  %s688_s2 = inlined_call_operand.vmem [shape: f32[8,128], index: 2, kind: output, shape index: {}]  }
   0x1   :  { %526 = vmatprep.subr.bf16.mxu0 %v589_v0  ;;  %v575_v1 = vld [vmem:[%s686_s1 + $0x10] sm:$0xff]   ;;  %530 = vmatprep.mubr.msk.bf16.mxu0 %vm590_vm0, %v589_v0  ;;  %v576_v2 = vld [vmem:[%s686_s1 + $0x18] sm:$0xff]   ;;  %v12_v3 = vld [vmem:[%s687_s0] sm:$0xff]  ;;  %vm133_vm3 = vcmask 523264   ;;  %vm314_vm4 = vcmask 64512  }
   0x2   :  { %534 = vmatprep.subr.bf16.mxu1 %v589_v0  ;;  %542 = vmatprep.mubr.msk.bf16.mxu1 %vm590_vm0, %v589_v0  ;;  %v13_v4 = vpack.c.bf16 %v12_v3, %v12_v3  ;;  %v577_v5 = vld [vmem:[%s686_s1 + $0x20] sm:$0xff]   ;;  %v578_v6 = vld [vmem:[%s686_s1 + $0x28] sm:$0xff]   ;;  %v579_v7 = vld [vmem:[%s686_s1 + $0x30] sm:$0xff]   ;;  %v649_v11 = vshrl.u32 %v38_v10, 7  ;;  %v99_v21 = vand.u32 127, %v38_v10 }
   0x3   :  { %527 = vmatpush3.bf16.msra.mxu0 %v575_v1  ;;  %535 = vmatpush3.bf16.msra.mxu1 %v577_v5  ;;  %v580_v8 = vld [vmem:[%s686_s1 + $0x38] sm:$0xff]   ;;  %v581_v9 = vld [vmem:[%s686_s1] sm:$0xff]   ;;  %v582_v26 = vld [vmem:[%s686_s1 + $0x8] sm:$0xff]   ;;  %v593_v5 = vmov 32  }
   0x4   :  { %528 = vmatprep.subr.bf16.mxu0 %v589_v0  ;;  %536 = vmatprep.subr.bf16.mxu1 %v589_v0  ;;  %v30_v12 = vld [vmem:[%s686_s1 + $0x40] sm:$0x1]  ;;  %v40_v14 = vsub.s32 0, %v649_v11  ;;  %vm100_vm2 = vcmp.lt.s32.totalorder %v99_v21, 32  ;;  %v107_v27 = vsub.s32 1, %v649_v11  ;;  %v180_v37 = vsub.s32 2, %v649_v11 }
   0x5   :  { %v31_v13 = vunpack.c.l.bf16 %v30_v12  ;;  %v32_v35 = vld [vmem:[%s686_s1 + $0x40] sm:$0x2]  ;;  %v34_v45 = vld [vmem:[%s686_s1 + $0x44] sm:$0xff]   ;;  %v477_v63 = vsub.s32 3, %v649_v11  ;;  %574 = vset.pattern.permute.xlu0 %v593_v5 }
   0x6   :  { %v33_v36 = vunpack.c.l.bf16 %v32_v35  ;;  %v35_v46 = vunpack.c.l.bf16 %v34_v45  ;;  %v37_v60 = vunpack.c.h.bf16 %v34_v45 }
   0x7   :  { %529 = vmatpush3.bf16.msra.mxu0 %v576_v2  ;;  %537 = vmatpush3.bf16.msra.mxu1 %v578_v6  ;;  %v41_v15 = vrot.slane %v31_v13, %v40_v14  ;;  %v108_v28 = vrot.slane %v31_v13, %v107_v27 }
   0x8   :  { %546 = vmatprep.subr.bf16.mxu0 %v589_v0  ;;  %538 = vmatprep.subr.bf16.mxu1 %v589_v0  ;;  %v181_v38 = vrot.slane %v33_v36, %v180_v37 }
   0xa   :  { %531 = vmatmul.mubr.msk.bf16.vlgmr.msra.gmra.mrb[0].mxu0 %vm54_vm1, %v13_v4 }
   0xb   :  { %550 = vmatprep.mubr.msk.bf16.mxu0 %vm590_vm0, %v589_v0  ;;  %539 = vmatpush3.bf16.msra.mxu1 %v579_v7 }
   0xc   :  { %540 = vmatprep.subr.bf16.mxu1 %v589_v0  ;;  %547 = vmatpush3.bf16.msra.mxu0 %v581_v9 }
   0xd   :  { %548 = vmatprep.subr.bf16.mxu0 %v589_v0 }
   0xf   :  { %541 = vmatpush3.bf16.msra.mxu1 %v580_v8 }
  0x10   :  { %559 = vmatprep.subr.mxu1 %v589_v0  ;;  %549 = vmatpush3.bf16.msra.mxu0 %v582_v26 }
  0x11   :  { %554 = vmatprep.subr.mxu0 %v589_v0 }
  0xdd   :  { %v92_v16 = vpop.f32.mrb[0].mxu0 }
  0xde   :  { %v93_v17 = vadd.f32 %v92_v16, %v41_v15  ;;  %v532_v18 = vpop.f32.mrb[1].mxu0 }
  0xdf   :  { %v95_v19 = vpop.f32.mrb[2].mxu0 }
  0xe0   :  { %583 = vtanh.f32 %v93_v17  ;;  %v533_v20 = vpop.f32.mrb[3].mxu0  ;;  %v101_v22 = vmax.f32 %v93_v17, 0.0 }
  0xea   :  { %v584_v23 = vpop.eup %583 }
  0xeb   :  { %v103_v24 = vsel %vm100_vm2, %v101_v22, %v584_v23 }
  0xec   :  { %v104_v25 = vpack.c.bf16 %v103_v24, %v103_v24 }
  0xee   :  { %543 = vmatmul.mubr.msk.bf16.vlgmr.msra.gmra.mrb[0].mxu1 %vm133_vm3, %v104_v25 }
  0xef   :  { %561 = vmatprep.mubr.msk.f32.mxu1 %vm590_vm0, %v589_v0 }
 0x1c1   :  { %v171_v29 = vpop.f32.mrb[0].mxu1 }
 0x1c2   :  { %v172_v30 = vadd.f32 %v171_v29, %v108_v28  ;;  %v544_v31 = vpop.f32.mrb[1].mxu1 }
 0x1c3   :  { %v174_v32 = vpop.f32.mrb[2].mxu1 }
 0x1c4   :  { %v177_v33 = vpack.c.bf16 %v172_v30, %v172_v30  ;;  %v545_v34 = vpop.f32.mrb[3].mxu1 }
 0x1c6   :  { %551 = vmatmul.mubr.msk.bf16.vlgmr.msra.gmra.mrb[4].mxu0 %vm54_vm1, %v177_v33 }
 0x1c7   :  { %556 = vmatprep.mubr.msk.f32.mxu0 %vm590_vm0, %v589_v0 }
 0x299   :  { %v231_v39 = vpop.f32.mrb[4].mxu0 }
 0x29a   :  { %v232_v40 = vadd.f32 %v231_v39, %v181_v38  ;;  %v552_v41 = vpop.f32.mrb[5].mxu0 }
 0x29b   :  { %v234_v42 = vpop.f32.mrb[6].mxu0 }
 0x29c   :  { %238 = vrot.lane.b32.xlu0 %v232_v40, %s591_s30  ;;  %v553_v43 = vpop.f32.mrb[7].mxu0 }
 0x30e   :  { %v239_v44 = vpop.permute.xlu0 %238 }
 0x30f   :  { %555 = vmatpush3.xpose.msk.msra.mxu0 %vm54_vm1, %v239_v44 }
 0x310   :  { %564 = vmatprep.subr.mxu0 %v589_v0 }
 0x312   :  { %557 = vmatmul.mubr.msk.f32.vlgmr.msra.gmra.mrb[8].mxu0 %vm54_vm1, %v232_v40 }
 0x313   :  { %566 = vmatprep.mubr.msk.f32.mxu0 %vm590_vm0, %v589_v0  ;;  %v478_v0 = vrot.slane %v33_v36, %v477_v63 }
 0x3e5   :  { %v310_v47 = vpop.f32.mrb[8].mxu0 }
 0x3e6   :  { %v311_v48 = vadd.f32 %v310_v47, %v35_v46  ;;  %v558_v49 = vpop.f32.mrb[9].mxu0 }
 0x3e8   :  { %v315_v50 = vsel %vm314_vm4, %v311_v48, -inf }
 0x3e9   :  { %316 = vmax.xlane.f32.xlu0 %v315_v50 }
 0x476   :  { %v317_v51 = vpop.xlane.xlu0 %316 }
 0x477   :  { %v318_v52 = vsub.f32 %v311_v48, %v317_v51 }
 0x479   :  { %v319_v53 = vmul.f32 1.442695, %v318_v52 }
 0x47b   :  { %585 = vpow2.f32 %v319_v53 }
 0x485   :  { %v586_v54 = vpop.eup %585 }
 0x486   :  { %v321_v55 = vsel %vm314_vm4, %v586_v54, 0.0 }
 0x487   :  { %322 = vadd.xlane.f32.xlu1 %v321_v55 }
 0x498   :  { %326 = vrot.lane.b32.xlu1 %v232_v40, %s592_s5 }
 0x514   :  { %v323_v56 = vpop.xlane.xlu1 %322 }
 0x515   :  { %587 = vrcp.f32 %v323_v56 }
 0x518   :  { %v327_v57 = vpop.permute.xlu1 %326 }
 0x519   :  { %560 = vmatpush3.msra.mxu1 %v327_v57 }
 0x51f   :  { %v588_v58 = vpop.eup %587 }
 0x520   :  { %v325_v59 = vmul.f32 %v588_v58, %v586_v54 }
 0x522   :  { %562 = vmatmul.mubr.msk.f32.vlgmr.msra.gmra.mrb[4].mxu1 %vm314_vm4, %v325_v59 }
 0x5f5   :  { %v398_v61 = vpop.f32.mrb[4].mxu1 }
 0x5f6   :  { %v563_v62 = vpop.f32.mrb[5].mxu1  ;;  %565 = vmatpush3.msra.mxu0 %v398_v61 }
 0x5f7   :  { %567 = vmatmul.mubr.msk.f32.vlgmr.msra.gmra.mrb[10].mxu0 %vm314_vm4, %v37_v60 }
 0x6ca   :  { %v471_v1 = vpop.f32.mrb[10].mxu0 }
 0x6cb   :  { %v479_v2 = vmul.f32 %v478_v0, %v471_v1  ;;  %v568_v3 = vpop.f32.mrb[11].mxu0 }
 0x6cd   :  { %v480_v4 = vsel %vm54_vm1, %v479_v2, 0.0 }
 0x6ce   :  { %481 = vadd.xlane.f32.xlu1 %v480_v4 }
 0x75b   :  { %v482_v6 = vpop.xlane.xlu1 %481 }
 0x75c   :  { %v483_v7 = vadd.f32 %v482_v6, %v478_v0 }
 0x75e   :  { %486 = vperm.xlu0 %574, %v483_v7  }
 0x7dd   :  { %v487_v8 = vpop.permute.xlu0 %486 }
 0x7de   :  { %489 = vst [vmem:[%s688_s2] sm:$0xff] %v487_v8 }

</bundles_post_ra>
